<compile_context>
chip_gen: v5e
topology: v5e:2x2
jax: 0.10.0
libtpu: 0.0.40
codegen_flags: <defaults>
</compile_context>

<pallas_src>
import functools

import numpy as np
import jax
import jax.numpy as jnp
from jax import lax
from jax.experimental import pallas as pl
from jax.experimental.pallas import tpu as pltpu


# Contract the feature (last) dim of both operands: anchor @ ll.T with no
# in-kernel transpose / relayout of the gathered table.
_CONTRACT_D = (((1,), (1,)), ((), ()))

_NEG_BIG = -1e30           # finite "-inf" for masked logits (exp underflows to 0)

# Set to jnp.bfloat16 on v6e/v7x for ~2-4x MXU throughput (f32 accumulate and
# f32 elementwise math are kept either way; v5e: keep elementwise f32).
MXU_DTYPE = jnp.float32


def _round_up(x, m):
    return ((x + m - 1) // m) * m


def _pad_cols(x, d_pad):
    d = x.shape[-1]
    return x if d == d_pad else jnp.pad(x, ((0, 0), (0, d_pad - d)))


def _pad_square(x, d_pad):
    d = x.shape[0]
    return x if d == d_pad else jnp.pad(x, ((0, d_pad - d), (0, d_pad - d)))


def unique_padded(ids):
    """Jittable torch.unique replacement: sorted unique values in the first
    `n` slots (remaining slots hold index 0, masked downstream), plus `n`."""
    s = jnp.sort(ids)
    is_first = jnp.concatenate([jnp.ones((1,), dtype=bool), s[1:] != s[:-1]])
    n = jnp.sum(is_first.astype(jnp.int32))
    pos = jnp.cumsum(is_first.astype(jnp.int32)) - 1     # dups map to same slot
    uniq = jnp.full_like(s, 0).at[pos].set(s)
    return uniq, n


# ----------------------------------------------------------------------------- kernels

def item_mlp_kernel(x_ref, w1_ref, b1_ref, w2_ref, b2_ref, o_ref, *, mxu_dtype):
    """y = LeakyReLU(x @ W1 + b1) @ W2 + b2 (weights stored pre-transposed)."""
    x = x_ref[...]
    h = jnp.dot(x.astype(mxu_dtype), w1_ref[...].astype(mxu_dtype),
                preferred_element_type=jnp.float32) + b1_ref[...]
    h = jnp.maximum(h, 0.01 * h)                    # nn.LeakyReLU default slope
    y = jnp.dot(h.astype(mxu_dtype), w2_ref[...].astype(mxu_dtype),
                preferred_element_type=jnp.float32) + b2_ref[...]
    o_ref[...] = y


def fused_loss_kernel(counts_ref,
                      pos_item_ref, pos_feat_ref, pos_user_ref,
                      all_feat_ref, all_user_ref, all_item_ref,
                      con_ref, reg_ref,
                      *, inv_temp, con_weight, batch, tile_b, d_true, mxu_dtype):
    """Batch-tiled contrastive + reg loss with (1,1) accumulator outputs."""
    i = pl.program_id(0)
    n_item = counts_ref[0]          # valid rows of all_feat / all_item
    n_user = counts_ref[1]          # valid rows of all_user
    n_pad = all_feat_ref.shape[0]

    # ---- one-time init + reg loss (all_* blocks are resident: constant index)
    @pl.when(i == 0)
    def _():
        con_ref[...] = jnp.zeros_like(con_ref)
        row = lax.broadcasted_iota(jnp.int32, (n_pad, 1), 0)
        m_item = (row < n_item).astype(jnp.float32)
        m_user = (row < n_user).astype(jnp.float32)
        ai = all_item_ref[...]
        au = all_user_ref[...]
        af = all_feat_ref[...]
        di = (n_item * d_true).astype(jnp.float32)   # true element counts
        du = (n_user * d_true).astype(jnp.float32)
        ra = jnp.sum(ai * ai * m_item, axis=(0, 1), keepdims=True) / di
        ru = jnp.sum(au * au * m_user, axis=(0, 1), keepdims=True) / du
        rf = jnp.sum(af * af * m_item, axis=(0, 1), keepdims=True) / di
        reg_ref[...] = (ra + ru + rf) / 3.0

    # ---- contrastive terms for this batch tile (max-shifted log domain)
    col = lax.broadcasted_iota(jnp.int32, (1, n_pad), 1)
    row_g = i * tile_b + lax.broadcasted_iota(jnp.int32, (tile_b, 1), 0)
    valid = (row_g < batch).astype(jnp.float32)      # mask partial last tile

    def lse_minus_pos(anchor, pos, ll_ref, n_valid):
        a = anchor * inv_temp                        # fold 1/T into the anchor
        pos_score = jnp.sum(a * pos, axis=1, keepdims=True)        # (tb,1)
        s = lax.dot_general(a.astype(mxu_dtype), ll_ref[...].astype(mxu_dtype),
                            _CONTRACT_D, preferred_element_type=jnp.float32)
        s = jnp.where(col < n_valid, s, _NEG_BIG)    # mask padded unique rows
        m = jnp.max(s, axis=1, keepdims=True)
        lse = jnp.log(jnp.sum(jnp.exp(s - m), axis=1, keepdims=True)) + m
        return lse - pos_score                       # (tb,1)

    t1 = lse_minus_pos(pos_item_ref[...], pos_feat_ref[...], all_feat_ref, n_item)
    t2 = lse_minus_pos(pos_feat_ref[...], pos_user_ref[...], all_user_ref, n_user)

    tile_sum = jnp.sum((t1 * con_weight + t2) * valid, axis=(0, 1), keepdims=True)
    con_ref[...] += tile_sum * (0.5 / batch)


# ----------------------------------------------------------------------------- wrappers

def run_item_mlp(x, w1, b1, w2, b2, tile_m=512, mxu_dtype=MXU_DTYPE):
    """Row-tiled item MLP: weights resident, rows pipelined + megacore-parallel."""
    n, d = x.shape
    tm = n if n < tile_m else tile_m       # small n: full-extent block (legal)
    grid = (pl.cdiv(n, tm),)
    return pl.pallas_call(
        functools.partial(item_mlp_kernel, mxu_dtype=mxu_dtype),
        out_shape=jax.ShapeDtypeStruct((n, d), jnp.float32),
        grid=grid,
        in_specs=[
            pl.BlockSpec((tm, d), lambda i: (i, 0)),     # x: row tile
            pl.BlockSpec((d, d), lambda i: (0, 0)),      # W1: resident
            pl.BlockSpec((1, d), lambda i: (0, 0)),      # b1: resident
            pl.BlockSpec((d, d), lambda i: (0, 0)),      # W2: resident
            pl.BlockSpec((1, d), lambda i: (0, 0)),      # b2: resident
        ],
        out_specs=pl.BlockSpec((tm, d), lambda i: (i, 0)),
        compiler_params=pltpu.CompilerParams(dimension_semantics=("parallel",)),
    )(x, w1, b1, w2, b2)


def run_fused_loss(counts, pos_item, pos_feat, pos_user,
                   all_feat, all_user, all_item,
                   temp, con_weight, d_true, tile_b=256, mxu_dtype=MXU_DTYPE):
    """One launch: both contrastive terms + reg loss, tiled over the batch."""
    b, d_pad = pos_item.shape
    n_pad = all_feat.shape[0]
    tb = b if b <= tile_b else tile_b
    grid = (pl.cdiv(b, tb),)
    kernel = functools.partial(
        fused_loss_kernel,
        inv_temp=1.0 / float(temp), con_weight=float(con_weight),
        batch=b, tile_b=tb, d_true=int(d_true), mxu_dtype=mxu_dtype)
    con, reg = pl.pallas_call(
        kernel,
        out_shape=(jax.ShapeDtypeStruct((1, 1), jnp.float32),
                   jax.ShapeDtypeStruct((1, 1), jnp.float32)),
        grid_spec=pltpu.PrefetchScalarGridSpec(
            num_scalar_prefetch=1,                       # counts -> SMEM
            grid=grid,
            in_specs=[
                pl.BlockSpec((tb, d_pad), lambda i, c: (i, 0)),     # pos_item
                pl.BlockSpec((tb, d_pad), lambda i, c: (i, 0)),     # pos_feat
                pl.BlockSpec((tb, d_pad), lambda i, c: (i, 0)),     # pos_user
                pl.BlockSpec((n_pad, d_pad), lambda i, c: (0, 0)),  # all_feat
                pl.BlockSpec((n_pad, d_pad), lambda i, c: (0, 0)),  # all_user
                pl.BlockSpec((n_pad, d_pad), lambda i, c: (0, 0)),  # all_item
            ],
            out_specs=(pl.BlockSpec((1, 1), lambda i, c: (0, 0)),
                       pl.BlockSpec((1, 1), lambda i, c: (0, 0))),
        ),
        # batch axis accumulates into a shared (1,1) block -> reduction axis.
        compiler_params=pltpu.CompilerParams(dimension_semantics=("arbitrary",)),
    )(counts, pos_item, pos_feat, pos_user, all_feat, all_user, all_item)
    return con[0, 0], reg[0, 0]


@functools.partial(jax.jit, static_argnames=("temp_value", "con_weight", "d_true"))
def cr_forward(user_matrix, item_matrix, item_fixed, user_ids, item_ids,
               *, temp_value, con_weight, d_true):
    # jittable torch.unique replacement: static shapes, no device->host sync.
    item_uniq, n_item = unique_padded(item_ids)
    user_uniq, n_user = unique_padded(user_ids)
    counts = jnp.stack([n_item, n_user]).astype(jnp.int32)

    # TODO(synk): fold these gathers into the loss kernel (scalar-prefetch ids +
    #             per-row DMA) to avoid materializing gathered copies in HBM.
    pos_item = jnp.take(item_matrix, item_ids, axis=0)
    all_item = jnp.take(item_matrix, item_uniq, axis=0)
    pos_user = jnp.take(user_matrix, user_ids, axis=0)
    all_user = jnp.take(user_matrix, user_uniq, axis=0)
    pos_feat = jnp.take(item_fixed, item_ids, axis=0)
    all_feat = jnp.take(item_fixed, item_uniq, axis=0)

    return run_fused_loss(counts, pos_item, pos_feat, pos_user,
                          all_feat, all_user, all_item,
                          temp_value, con_weight, d_true)


class CRPallas:
    """Pallas re-implementation of CR.forward (and the item MLP used to build item_fixed)."""

    def __init__(self, key, user_size, item_size, dim, temp_value=0.2,
                 con_weight=1.0, reg_weight=0.001):
        self.temp_value = float(temp_value)
        self.con_weight = float(con_weight)
        self.reg_weight = float(reg_weight)
        self.dim = int(dim)
        self.dim_pad = _round_up(self.dim, 128)   # lane-dense feature axis
        d, dp = self.dim, self.dim_pad
        k = jax.random.split(key, 7)
        # nn.init.normal_(std=0.01) embeddings, zero-padded to dp columns
        self.user_matrix = _pad_cols(0.01 * jax.random.normal(k[0], (user_size, d), jnp.float32), dp)
        self.item_matrix = _pad_cols(0.01 * jax.random.normal(k[1], (item_size, d), jnp.float32), dp)
        # item_features (fixed, not trained); dim_mlp == dim (required by contrastive_loss)
        self.item_features = _pad_cols(jax.random.normal(k[2], (item_size, d), jnp.float32), dp)
        # item_mlp: Linear(d,d) -> LeakyReLU -> Linear(d,d); weights stored
        # pre-transposed ((in,out) orientation => canonical (K,N) MXU layout).
        bound = 1.0 / np.sqrt(d)
        self.w1 = _pad_square(jax.random.uniform(k[3], (d, d), jnp.float32, -bound, bound), dp)
        self.b1 = _pad_cols(jax.random.uniform(k[4], (1, d), jnp.float32, -bound, bound), dp)
        self.w2 = _pad_square(jax.random.uniform(k[5], (d, d), jnp.float32, -bound, bound), dp)
        self.b2 = _pad_cols(jax.random.uniform(k[6], (1, d), jnp.float32, -bound, bound), dp)

    def item_mlp(self):
        return run_item_mlp(self.item_features, self.w1, self.b1, self.w2, self.b2)

    def forward(self, item_fixed, user_ids, item_ids):
        return cr_forward(self.user_matrix, self.item_matrix, item_fixed,
                          user_ids, item_ids,
                          temp_value=self.temp_value,
                          con_weight=self.con_weight,
                          d_true=self.dim)


# ----------------------------------------------------------------------------- reference (pure JAX, true dim)

def _reference_forward(model, item_fixed, user_ids, item_ids):
    d = model.dim
    def closs(a, p, ll):
        ps = jnp.sum(a * p, axis=1)
        al = a @ ll.T
        return jnp.mean(-jnp.log(jnp.exp(ps / model.temp_value) /
                                 jnp.sum(jnp.exp(al / model.temp_value), axis=1)))
    uq_u = jnp.asarray(np.unique(np.asarray(user_ids)))
    uq_i = jnp.asarray(np.unique(np.asarray(item_ids)))
    im = model.item_matrix[:, :d]; um = model.user_matrix[:, :d]; fx = item_fixed[:, :d]
    pi = im[item_ids]; ai = im[uq_i]
    pu = um[user_ids]; au = um[uq_u]
    pf = fx[item_ids]; af = fx[uq_i]
    c1 = closs(pi, pf, af) * model.con_weight
    c2 = closs(pf, pu, au)
    reg = (jnp.mean(ai ** 2) + jnp.mean(au ** 2) + jnp.mean(af ** 2)) / 3.0
    return (c1 + c2) / 2.0, reg


# ----------------------------------------------------------------------------- main

if __name__ == "__main__":
    key = jax.random.PRNGKey(0)
    USER_SIZE, ITEM_SIZE, DIM, BATCH = 10, 12, 32, 8

    model = CRPallas(key, USER_SIZE, ITEM_SIZE, DIM,
                     temp_value=0.2, con_weight=1.0, reg_weight=0.001)

    ku, ki = jax.random.split(jax.random.PRNGKey(1))
    user_ids = jax.random.randint(ku, (BATCH,), 0, USER_SIZE, dtype=jnp.int32)
    item_ids = jax.random.randint(ki, (BATCH,), 0, ITEM_SIZE, dtype=jnp.int32)

    # item_fixed = item_mlp(item_features)  (as done in CR.train before forward)
    item_fixed = model.item_mlp()
    contrastive_loss, reg_loss = model.forward(item_fixed, user_ids, item_ids)
    contrastive_loss = jax.block_until_ready(contrastive_loss)
    reg_loss = jax.block_until_ready(reg_loss)

    # --- self-check against a pure-JAX reference at the true (unpadded) dim
    d = model.dim
    x = model.item_features[:, :d]
    pre = x @ model.w1[:d, :d] + model.b1[:, :d]
    ref_fixed = jnp.maximum(pre, 0.01 * pre) @ model.w2[:d, :d] + model.b2[:, :d]
    assert np.allclose(np.asarray(item_fixed[:, :d]), np.asarray(ref_fixed),
                       rtol=1e-5, atol=1e-5)
    if model.dim_pad > d:   # zero-padded output columns stay (numerically) zero
        assert np.allclose(np.asarray(item_fixed[:, d:]), 0.0, atol=1e-6)

    ref_cl, ref_reg = _reference_forward(model, item_fixed, user_ids, item_ids)
    assert np.allclose(float(contrastive_loss), float(ref_cl), rtol=1e-4, atol=1e-5)
    assert np.allclose(float(reg_loss), float(ref_reg), rtol=1e-4, atol=1e-6)

    print("KERNEL_OK")
</pallas_src>

<mosaic_0001>
module attributes {stable_mosaic.version = 11 : i64} {
  func.func @item_mlp_kernel(%arg0: i32, %arg1: memref<12x128xf32, #tpu.memory_space<vmem>>, %arg2: memref<128x128xf32, #tpu.memory_space<vmem>>, %arg3: memref<1x128xf32, #tpu.memory_space<vmem>>, %arg4: memref<128x128xf32, #tpu.memory_space<vmem>>, %arg5: memref<1x128xf32, #tpu.memory_space<vmem>>, %arg6: memref<12x128xf32, #tpu.memory_space<vmem>>) attributes {dimension_semantics = [#tpu.dimension_semantics<parallel>], iteration_bounds = array<i64: 1>, scalar_prefetch = 0 : i64, scratch_operands = 0 : i64, tpu.core_type = #tpu.core_type<tc>, window_params = [{transform_indices = @transform_0, window_bounds = array<i64: 12, 128>}, {pipeline_mode = #tpu.pipeline_mode<synchronous>, transform_indices = @transform_1, window_bounds = array<i64: 128, 128>}, {pipeline_mode = #tpu.pipeline_mode<synchronous>, transform_indices = @transform_2, window_bounds = array<i64: 1, 128>}, {pipeline_mode = #tpu.pipeline_mode<synchronous>, transform_indices = @transform_3, window_bounds = array<i64: 128, 128>}, {pipeline_mode = #tpu.pipeline_mode<synchronous>, transform_indices = @transform_4, window_bounds = array<i64: 1, 128>}, {transform_indices = @transform_5, window_bounds = array<i64: 12, 128>}]} {
    %c0 = arith.constant 0 : index
    %c0_0 = arith.constant 0 : index
    %0 = vector.load %arg1[%c0, %c0_0] : memref<12x128xf32, #tpu.memory_space<vmem>>, vector<12x128xf32>
    %c0_1 = arith.constant 0 : index
    %c0_2 = arith.constant 0 : index
    %1 = vector.load %arg2[%c0_1, %c0_2] : memref<128x128xf32, #tpu.memory_space<vmem>>, vector<128x128xf32>
    %cst = arith.constant dense<0.000000e+00> : vector<12x128xf32>
    %2 = tpu.matmul %0, %1, %cst {dimension_numbers = #tpu.dot_dimension_numbers<[1], [0], [0], [1], [0, 0, 1, 1], [], []>} : vector<12x128xf32>, vector<128x128xf32>, vector<12x128xf32> -> vector<12x128xf32>
    %c0_3 = arith.constant 0 : index
    %c0_4 = arith.constant 0 : index
    %3 = vector.load %arg3[%c0_3, %c0_4] : memref<1x128xf32, #tpu.memory_space<vmem>>, vector<1x128xf32>
    %4 = vector.broadcast %3 : vector<1x128xf32> to vector<12x128xf32>
    %5 = arith.addf %2, %4 : vector<12x128xf32>
    %cst_5 = arith.constant 0.00999999977 : f32
    %6 = vector.broadcast %cst_5 : f32 to vector<12x128xf32>
    %7 = arith.mulf %6, %5 : vector<12x128xf32>
    %8 = arith.maximumf %5, %7 : vector<12x128xf32>
    %c0_6 = arith.constant 0 : index
    %c0_7 = arith.constant 0 : index
    %9 = vector.load %arg4[%c0_6, %c0_7] : memref<128x128xf32, #tpu.memory_space<vmem>>, vector<128x128xf32>
    %cst_8 = arith.constant dense<0.000000e+00> : vector<12x128xf32>
    %10 = tpu.matmul %8, %9, %cst_8 {dimension_numbers = #tpu.dot_dimension_numbers<[1], [0], [0], [1], [0, 0, 1, 1], [], []>} : vector<12x128xf32>, vector<128x128xf32>, vector<12x128xf32> -> vector<12x128xf32>
    %c0_9 = arith.constant 0 : index
    %c0_10 = arith.constant 0 : index
    %11 = vector.load %arg5[%c0_9, %c0_10] : memref<1x128xf32, #tpu.memory_space<vmem>>, vector<1x128xf32>
    %12 = vector.broadcast %11 : vector<1x128xf32> to vector<12x128xf32>
    %13 = arith.addf %10, %12 : vector<12x128xf32>
    %c0_11 = arith.constant 0 : index
    %c0_12 = arith.constant 0 : index
    %14 = vector.load %arg6[%c0_11, %c0_12] : memref<12x128xf32, #tpu.memory_space<vmem>>, vector<12x128xf32>
    tpu.vector_store %arg6[%c0_11, %c0_12], %13 {strides = array<i32>} : memref<12x128xf32, #tpu.memory_space<vmem>>, vector<12x128xf32>,
    return
  }
  func.func @transform_0(%arg0: i32) -> (i32, i32) {
    %c0_i32 = arith.constant 0 : i32
    %c0_i32_0 = arith.constant 0 : i32
    return %arg0, %c0_i32 : i32, i32
  }
  func.func @transform_1(%arg0: i32) -> (i32, i32) {
    %c0_i32 = arith.constant 0 : i32
    %c0_i32_0 = arith.constant 0 : i32
    %c0_i32_1 = arith.constant 0 : i32
    return %c0_i32, %c0_i32_0 : i32, i32
  }
  func.func @transform_2(%arg0: i32) -> (i32, i32) {
    %c0_i32 = arith.constant 0 : i32
    %c0_i32_0 = arith.constant 0 : i32
    %c0_i32_1 = arith.constant 0 : i32
    return %c0_i32, %c0_i32_0 : i32, i32
  }
  func.func @transform_3(%arg0: i32) -> (i32, i32) {
    %c0_i32 = arith.constant 0 : i32
    %c0_i32_0 = arith.constant 0 : i32
    %c0_i32_1 = arith.constant 0 : i32
    return %c0_i32, %c0_i32_0 : i32, i32
  }
  func.func @transform_4(%arg0: i32) -> (i32, i32) {
    %c0_i32 = arith.constant 0 : i32
    %c0_i32_0 = arith.constant 0 : i32
    %c0_i32_1 = arith.constant 0 : i32
    return %c0_i32, %c0_i32_0 : i32, i32
  }
  func.func @transform_5(%arg0: i32) -> (i32, i32) {
    %c0_i32 = arith.constant 0 : i32
    %c0_i32_0 = arith.constant 0 : i32
    return %arg0, %c0_i32 : i32, i32
  }
}

</mosaic_0001>

<bundles_post_ra>
// kernel: tpu_custom_call.1
= control target key start
LH: loop header
LB: loop body
LE: loop exit
PB: predicated region body
PF: predicated region fallthrough
CT: control target
= control target key end

     0   :  { %10 = vsyncpa [#allocation3], 0  ;;  %s390_s0 = inlined_call_operand.hbm [shape: f32[12,128], index: 0, kind: input, shape index: {}]   ;;  %s391_s1 = inlined_call_operand.hbm [shape: f32[128,128], index: 1, kind: input, shape index: {}]   ;;  %s392_s2 = inlined_call_operand.vmem [shape: f32[1,128], index: 2, kind: input, shape index: {}]   ;;  %s393_s3 = inlined_call_operand.hbm [shape: f32[128,128], index: 3, kind: input, shape index: {}]   ;;  %s394_s4 = inlined_call_operand.vmem [shape: f32[1,128], index: 4, kind: input, shape index: {}]   ;;  %s395_s5 = inlined_call_operand.hbm [shape: f32[12,128], index: 5, kind: output, shape index: {}]  }
   0x1   :  { %11 = vsyncpa [#allocation6], 0 }
   0x2   :  { %12 = vsyncpa [#allocation4], 0  ;;  %s30_s20 = sshll.u32 %s391_s1, 4  ;;  %s324_s21 = smov [#allocation5]   ;;  %s31_s20 = int_to_ptr.hbm [resolvable:$true] %s30_s20 }
   0x3   :  { %s32_s22 = sshll.u32 %s324_s21, 4  ;;  %s17_s25 = sshll.u32 %s390_s0, 4  ;;  %s33_s22 = int_to_ptr.vmem [resolvable:$true] %s32_s22  ;;  %s18_s25 = int_to_ptr.hbm [resolvable:$true] %s17_s25 }
   0x4   :  { %s325_s26 = smov 128   ;;  %s326_s27 = smov 8  }
   0x5   :  { %38 = dma.hbm_to_vmem [thread:$0]  %s31_s20, 2048, %s33_s22, [#allocation6], %s325_s26, %s325_s26, %s326_s27  }
   0x6   :  { %s327_s28 = smov [#allocation2]   ;;  %s45_s1 = sshll.u32 %s393_s3, 4  ;;  %s46_s1 = int_to_ptr.hbm [resolvable:$true] %s45_s1 }
   0x7   :  { %s19_s29 = sshll.u32 %s327_s28, 4  ;;  %s328_s0 = smov [#allocation7]   ;;  %s20_s29 = int_to_ptr.vmem [resolvable:$true] %s19_s29 }
   0x8   :  { %25 = dma.hbm_to_vmem [thread:$0]  %s18_s25, 256, %s20_s29, [#allocation3], %s325_s26, %s325_s26, %s326_s27  }
   0x9   :  { %s47_s7 = sshll.u32 %s328_s0, 4  ;;  %s48_s7 = int_to_ptr.vmem [resolvable:$true] %s47_s7 }
   0xa   :  { %53 = dma.hbm_to_vmem [thread:$0]  %s46_s1, 2048, %s48_s7, [#allocation6], %s325_s26, %s325_s26, %s326_s27  }
   0xb   :  { %318 = dma.done.wait [#allocation3], 256  }
   0xc   :  { %319 = vsyncadd [#allocation3], 4294967040 }
   0xd   :  { %320 = dma.done.wait [#allocation6], 4096  }
   0xe   :  { %321 = vsyncadd [#allocation6], 4294963200  ;;  %v85_v0 = vld [vmem:[#allocation5 + $0x78] sm:$0xff]  ;;  %v84_v1 = vld [vmem:[#allocation5 + $0x70] sm:$0xff]  ;;  %s329_s11 = smov [#allocation8]   ;;  %s168_s14 = sshll.u32 %s395_s5, 4  ;;  %s169_s14 = int_to_ptr.hbm [resolvable:$true] %s168_s14 }
   0xf   :  { %182 = vmatpush.msra.mxu2 %v85_v0  ;;  %90 = vmatpush.msra.mxu0 %v85_v0  ;;  %v83_v2 = vld [vmem:[#allocation5 + $0x68] sm:$0xff]  ;;  %v82_v3 = vld [vmem:[#allocation5 + $0x60] sm:$0xff]  ;;  %v81_v4 = vld [vmem:[#allocation5 + $0x58] sm:$0xff]  ;;  %s166_s12 = sshll.u32 %s329_s11, 4  ;;  %s167_s12 = int_to_ptr.vmem [resolvable:$true] %s166_s12 }
  0x10   :  { %v132_v5 = vld [vmem:[#allocation7 + $0x78] sm:$0xff]  ;;  %v131_v6 = vld [vmem:[#allocation7 + $0x70] sm:$0xff]  ;;  %v130_v8 = vld [vmem:[#allocation7 + $0x68] sm:$0xff] }
  0x11   :  { %183 = vmatpush.msra.mxu2 %v84_v1  ;;  %91 = vmatpush.msra.mxu0 %v84_v1  ;;  %v80_v7 = vld [vmem:[#allocation5 + $0x50] sm:$0xff]  ;;  %v79_v9 = vld [vmem:[#allocation5 + $0x48] sm:$0xff]  ;;  %v129_v10 = vld [vmem:[#allocation7 + $0x60] sm:$0xff] }
  0x12   :  { %198 = vmatpush.msra.mxu3 %v132_v5  ;;  %137 = vmatpush.msra.mxu1 %v132_v5  ;;  %v78_v11 = vld [vmem:[#allocation5 + $0x40] sm:$0xff]  ;;  %v128_v12 = vld [vmem:[#allocation7 + $0x58] sm:$0xff]  ;;  %v127_v14 = vld [vmem:[#allocation7 + $0x50] sm:$0xff] }
  0x13   :  { %184 = vmatpush.msra.mxu2 %v83_v2  ;;  %92 = vmatpush.msra.mxu0 %v83_v2  ;;  %v77_v13 = vld [vmem:[#allocation5 + $0x38] sm:$0xff]  ;;  %v76_v15 = vld [vmem:[#allocation5 + $0x30] sm:$0xff]  ;;  %v126_v16 = vld [vmem:[#allocation7 + $0x48] sm:$0xff] }
  0x14   :  { %199 = vmatpush.msra.mxu3 %v131_v6  ;;  %138 = vmatpush.msra.mxu1 %v131_v6  ;;  %v75_v17 = vld [vmem:[#allocation5 + $0x28] sm:$0xff]  ;;  %v125_v18 = vld [vmem:[#allocation7 + $0x40] sm:$0xff]  ;;  %v124_v20 = vld [vmem:[#allocation7 + $0x38] sm:$0xff] }
  0x15   :  { %185 = vmatpush.msra.mxu2 %v82_v3  ;;  %93 = vmatpush.msra.mxu0 %v82_v3  ;;  %v74_v19 = vld [vmem:[#allocation5 + $0x20] sm:$0xff]  ;;  %v73_v21 = vld [vmem:[#allocation5 + $0x18] sm:$0xff]  ;;  %v123_v22 = vld [vmem:[#allocation7 + $0x30] sm:$0xff] }
  0x16   :  { %200 = vmatpush.msra.mxu3 %v130_v8  ;;  %139 = vmatpush.msra.mxu1 %v130_v8  ;;  %v72_v23 = vld [vmem:[#allocation5 + $0x10] sm:$0xff]  ;;  %v122_v24 = vld [vmem:[#allocation7 + $0x28] sm:$0xff]  ;;  %v121_v26 = vld [vmem:[#allocation7 + $0x20] sm:$0xff] }
  0x17   :  { %186 = vmatpush.msra.mxu2 %v81_v4  ;;  %94 = vmatpush.msra.mxu0 %v81_v4  ;;  %v71_v25 = vld [vmem:[#allocation5 + $0x8] sm:$0xff]  ;;  %v70_v27 = vld [vmem:[#allocation5] sm:$0xff]  ;;  %v69_v28 = vld [vmem:[#allocation2 + $0x8] sm:$0xf] }
  0x18   :  { %201 = vmatpush.msra.mxu3 %v129_v10  ;;  %140 = vmatpush.msra.mxu1 %v129_v10  ;;  %v68_v29 = vld [vmem:[#allocation2] sm:$0xff]  ;;  %v120_v30 = vld [vmem:[#allocation7 + $0x18] sm:$0xff]  ;;  %v118_v32 = vld [vmem:[#allocation7 + $0x8] sm:$0xff] }
  0x19   :  { %187 = vmatpush.msra.mxu2 %v80_v7  ;;  %95 = vmatpush.msra.mxu0 %v80_v7  ;;  %v119_v31 = vld [vmem:[#allocation7 + $0x10] sm:$0xff]  ;;  %v117_v33 = vld [vmem:[#allocation7] sm:$0xff] }
  0x1a   :  { %202 = vmatpush.msra.mxu3 %v128_v12  ;;  %141 = vmatpush.msra.mxu1 %v128_v12  ;;  %v220_v34 = vld [vmem:[%s392_s2] ss:$0 sm:$0xff] }
  0x1b   :  { %188 = vmatpush.msra.mxu2 %v79_v9  ;;  %96 = vmatpush.msra.mxu0 %v79_v9  ;;  %v221_v43 = vld [vmem:[%s394_s4] ss:$0 sm:$0xff] }
  0x1c   :  { %203 = vmatpush.msra.mxu3 %v127_v14  ;;  %142 = vmatpush.msra.mxu1 %v127_v14 }
  0x1d   :  { %189 = vmatpush.msra.mxu2 %v78_v11  ;;  %97 = vmatpush.msra.mxu0 %v78_v11 }
  0x1e   :  { %204 = vmatpush.msra.mxu3 %v126_v16  ;;  %143 = vmatpush.msra.mxu1 %v126_v16 }
  0x1f   :  { %190 = vmatpush.msra.mxu2 %v77_v13  ;;  %98 = vmatpush.msra.mxu0 %v77_v13 }
  0x20   :  { %205 = vmatpush.msra.mxu3 %v125_v18  ;;  %144 = vmatpush.msra.mxu1 %v125_v18 }
  0x21   :  { %191 = vmatpush.msra.mxu2 %v76_v15  ;;  %99 = vmatpush.msra.mxu0 %v76_v15 }
  0x22   :  { %206 = vmatpush.msra.mxu3 %v124_v20  ;;  %145 = vmatpush.msra.mxu1 %v124_v20 }
  0x23   :  { %192 = vmatpush.msra.mxu2 %v75_v17  ;;  %100 = vmatpush.msra.mxu0 %v75_v17 }
  0x24   :  { %207 = vmatpush.msra.mxu3 %v123_v22  ;;  %146 = vmatpush.msra.mxu1 %v123_v22 }
  0x25   :  { %193 = vmatpush.msra.mxu2 %v74_v19  ;;  %101 = vmatpush.msra.mxu0 %v74_v19 }
  0x26   :  { %208 = vmatpush.msra.mxu3 %v122_v24  ;;  %147 = vmatpush.msra.mxu1 %v122_v24 }
  0x27   :  { %194 = vmatpush.msra.mxu2 %v73_v21  ;;  %102 = vmatpush.msra.mxu0 %v73_v21 }
  0x28   :  { %209 = vmatpush.msra.mxu3 %v121_v26  ;;  %148 = vmatpush.msra.mxu1 %v121_v26 }
  0x29   :  { %195 = vmatpush.msra.mxu2 %v72_v23  ;;  %103 = vmatpush.msra.mxu0 %v72_v23 }
  0x2a   :  { %210 = vmatpush.msra.mxu3 %v120_v30  ;;  %149 = vmatpush.msra.mxu1 %v120_v30 }
  0x2b   :  { %196 = vmatpush.msra.mxu2 %v71_v25  ;;  %104 = vmatpush.msra.mxu0 %v71_v25 }
  0x2c   :  { %211 = vmatpush.msra.mxu3 %v119_v31  ;;  %150 = vmatpush.msra.mxu1 %v119_v31 }
  0x2d   :  { %197 = vmatpush.msra.mxu2 %v70_v27  ;;  %105 = vmatpush.msra.mxu0 %v70_v27 }
  0x2e   :  { %109 = vmatmul.f32.vlgmr.msra.gmra.mxu2 %v69_v28  ;;  %106 = vmatmul.f32.vlgmr.msra.gmra.mxu0 %v68_v29 }
  0x2f   :  { %212 = vmatpush.msra.mxu3 %v118_v32  ;;  %151 = vmatpush.msra.mxu1 %v118_v32 }
  0x31   :  { %213 = vmatpush.msra.mxu3 %v117_v33  ;;  %152 = vmatpush.msra.mxu1 %v117_v33 }
  0xab   :  { %v107_v35 = vpop.f32.mrf.mxu0 }
  0xac   :  { %v108_v36 = vadd.f32 %v220_v34, %v107_v35 }
  0xae   :  { %v113_v37 = vmul.f32 0.01, %v108_v36 }
  0xb0   :  { %v115_v38 = vmax.f32 %v108_v36, %v113_v37 }
  0xb1   :  { %v110_v39 = vpop.f32.mrf.mxu2 }
  0xb2   :  { %v111_v40 = vadd.f32 %v220_v34, %v110_v39  ;;  %153 = vmatmul.f32.vlgmr.msra.gmra.mxu1 %v115_v38 }
  0xb4   :  { %v114_v41 = vmul.f32 0.01, %v111_v40 }
  0xb6   :  { %v116_v42 = vmax.f32 %v111_v40, %v114_v41 }
  0xb8   :  { %156 = vmatmul.f32.vlgmr.msra.gmra.mxu3 %v116_v42 }
 0x12f   :  { %v154_v44 = vpop.f32.mrf.mxu1 }
 0x130   :  { %v155_v45 = vadd.f32 %v221_v43, %v154_v44 }
 0x132   :  { %160 = vst [vmem:[#allocation8] sm:$0xff] %v155_v45 }
 0x13b   :  { %v157_v46 = vpop.f32.mrf.mxu3 }
 0x13c   :  { %v158_v47 = vadd.f32 %v221_v43, %v157_v46 }
 0x13e   :  { %161 = vst [vmem:[#allocation8 + $0x8] sm:$0xf] %v158_v47 }
 0x13f   :  { %174 = dma.vmem_to_hbm [thread:$0]  %s167_s12, 256, %s169_s14, [#allocation4], %s325_s26, %s325_s26, %s326_s27  }
 0x140   :  { %322 = dma.done.wait [#allocation4], 256  }
 0x141   :  { %323 = vsyncadd [#allocation4], 4294967040 }
 0x142   :  { %179 = vsyncpa [#allocation3], 1 }
 0x143   :  { %180 = vsyncpa [#allocation6], 1 }
 0x144   :  { %181 = vsyncpa [#allocation4], 1 }

</bundles_post_ra>
